<compile_context>
chip_gen: v7x
topology: tpu7x:2x2x1
jax: 0.10.0
libtpu: 0.0.40
codegen_flags: <defaults>
</compile_context>

<pallas_src>
import jax
import jax.numpy as jnp
from jax.experimental import pallas as pl
from jax.experimental.pallas import tpu as pltpu


def _cdiv(a, b):
    return -(-a // b)


def _choose_lane(total):
    """Largest multiple-of-128 divisor of `total` (capped at 16384), else None."""
    best = None
    lane = 128
    cap = min(total, 16384)
    while lane <= cap:
        if total % lane == 0:
            best = lane
        lane += 128
    return best


def _hbm_copy(x_flat):
    """Physical HBM->HBM copy of a 2-D array via direct DMA (no VMEM staging)."""
    rows, lane = x_flat.shape
    itemsize = jnp.dtype(x_flat.dtype).itemsize

    # Chunk the copy along the row axis.  Target ~8 MiB per DMA, but keep at
    # least 2 grid steps whenever rows >= 2 so v7x's two TensorCores both
    # participate in issuing DMAs.
    bytes_per_row = lane * itemsize
    chunk_rows = max(1, (8 * 1024 * 1024) // bytes_per_row)
    if rows >= 2:
        chunk_rows = min(chunk_rows, _cdiv(rows, 2))
    chunk_rows = min(chunk_rows, rows)
    nchunks = _cdiv(rows, chunk_rows)
    last = nchunks - 1
    rem_rows = rows - last * chunk_rows  # 1 <= rem_rows <= chunk_rows

    def kernel(x_ref, o_ref, sem):
        i = pl.program_id(0)

        # Full-size chunks (all but the last grid step).
        @pl.when(i != last)
        def _():
            start = i * chunk_rows
            cp = pltpu.make_async_copy(
                x_ref.at[pl.ds(start, chunk_rows), :],
                o_ref.at[pl.ds(start, chunk_rows), :],
                sem,
            )
            cp.start()
            cp.wait()

        # Last (possibly ragged) chunk, static size rem_rows.
        @pl.when(i == last)
        def _():
            start = last * chunk_rows
            cp = pltpu.make_async_copy(
                x_ref.at[pl.ds(start, rem_rows), :],
                o_ref.at[pl.ds(start, rem_rows), :],
                sem,
            )
            cp.start()
            cp.wait()

    total_bytes = 2 * rows * lane * itemsize  # read + write
    return pl.pallas_call(
        kernel,
        out_shape=jax.ShapeDtypeStruct((rows, lane), x_flat.dtype),
        grid=(nchunks,),
        in_specs=[pl.BlockSpec(memory_space=pl.ANY)],
        out_specs=pl.BlockSpec(memory_space=pl.ANY),
        scratch_shapes=[pltpu.SemaphoreType.DMA(())],
        compiler_params=pltpu.CompilerParams(
            dimension_semantics=("parallel",),
        ),
        cost_estimate=pl.CostEstimate(
            flops=0, transcendentals=0, bytes_accessed=total_bytes
        ),
    )(x_flat)


def unflatten(x, dim1, dim2, copy=False):
    """Pallas equivalent of UnFlatten(dim1, dim2).forward(x).

    copy=False (default): metadata-only reshape, zero HBM traffic.
    copy=True           : fresh buffer produced by a direct HBM->HBM DMA kernel.
    """
    B = x.shape[0]
    F = 1
    for d in x.shape[1:]:
        F *= d
    assert F % (dim1 * dim2) == 0, "features must factor into (C, dim1, dim2)"
    C = F // (dim1 * dim2)
    out_shape = (B, C, dim1, dim2)

    if not copy:
        # The op preserves contiguous element order exactly -> pure reshape.
        return x.reshape(out_shape)

    total = B * F
    lane = _choose_lane(total)
    if lane is None:
        # No multiple-of-128 divisor of the flat size: keep the full feature
        # axis as the (contiguous) last dim.  Never use a sub-128 lane width.
        rows, lane = B, F
    else:
        rows = total // lane

    # Metadata-only flat view; identical element order to the final output.
    x_flat = x.reshape(rows, lane)
    out_flat = _hbm_copy(x_flat)

    # Metadata-only reshape to the NCHW "unflattened" shape.
    return out_flat.reshape(out_shape)


if __name__ == "__main__":
    key = jax.random.PRNGKey(0)
    B, C, dim1, dim2 = 2, 4, 16, 16
    # Input as it would come out of a Linear layer: (B, C*dim1*dim2)
    x = jax.random.normal(key, (B, C * dim1 * dim2), dtype=jnp.float32)

    # Explicit-copy path exercises the Pallas DMA kernel.
    y = jax.block_until_ready(unflatten(x, dim1, dim2, copy=True))
    # Default path (metadata-only reshape).
    y0 = jax.block_until_ready(unflatten(x, dim1, dim2))

    # Reference: exact reshape semantics of the PyTorch forward.
    y_ref = x.reshape(B, -1, dim1, dim2)
    assert y.shape == (B, C, dim1, dim2)
    assert y.dtype == x.dtype
    assert bool(jnp.array_equal(y, y_ref))
    assert bool(jnp.array_equal(y0, y_ref))

    print("KERNEL_OK")
</pallas_src>

<mosaic_0001>
module attributes {stable_mosaic.version = 11 : i64} {
  func.func @kernel(%arg0: i32, %arg1: memref<1x2048xf32, #tpu.memory_space<any>>, %arg2: memref<1x2048xf32, #tpu.memory_space<any>>, %arg3: memref<!tpu.dma_semaphore, #tpu.memory_space<semaphore_mem>>) attributes {dimension_semantics = [#tpu.dimension_semantics<parallel>], iteration_bounds = array<i64: 1>, scalar_prefetch = 0 : i64, scratch_operands = 1 : i64, tpu.core_type = #tpu.core_type<tc>, window_params = [{}, {}]} {
    %c0_i32 = arith.constant 0 : i32
    %0 = arith.cmpi ne, %arg0, %c0_i32 : i32
    %1 = arith.extui %0 : i1 to i32
    %c0_i32_0 = arith.constant 0 : i32
    %2 = arith.cmpi ne, %1, %c0_i32_0 : i32
    scf.if %2 {
      %c1_i32 = arith.constant 1 : i32
      %6 = arith.muli %arg0, %c1_i32 : i32
      %c0_i32_3 = arith.constant 0 : i32
      %7 = tpu.memref_slice %arg1[%6, %c0_i32_3] : memref<1x2048xf32, #tpu.memory_space<any>> -> memref<1x2048xf32, #tpu.memory_space<any>>
      %c0_i32_4 = arith.constant 0 : i32
      %8 = tpu.memref_slice %arg2[%6, %c0_i32_4] : memref<1x2048xf32, #tpu.memory_space<any>> -> memref<1x2048xf32, #tpu.memory_space<any>>
      tpu.enqueue_dma source(%7 : memref<1x2048xf32, #tpu.memory_space<any>>) target(%8 : memref<1x2048xf32, #tpu.memory_space<any>>) target_semaphore(%arg3 : memref<!tpu.dma_semaphore, #tpu.memory_space<semaphore_mem>>)
      %c0_i32_5 = arith.constant 0 : i32
      %9 = tpu.memref_slice %arg1[%6, %c0_i32_5] : memref<1x2048xf32, #tpu.memory_space<any>> -> memref<1x2048xf32, #tpu.memory_space<any>>
      %c0_i32_6 = arith.constant 0 : i32
      %10 = tpu.memref_slice %arg2[%6, %c0_i32_6] : memref<1x2048xf32, #tpu.memory_space<any>> -> memref<1x2048xf32, #tpu.memory_space<any>>
      tpu.wait_dma2 semaphore(%arg3 : memref<!tpu.dma_semaphore, #tpu.memory_space<semaphore_mem>>) src(%9 : memref<1x2048xf32, #tpu.memory_space<any>>) dst(%10 : memref<1x2048xf32, #tpu.memory_space<any>>)
    } else {
    }
    %c0_i32_1 = arith.constant 0 : i32
    %3 = arith.cmpi eq, %arg0, %c0_i32_1 : i32
    %4 = arith.extui %3 : i1 to i32
    %c0_i32_2 = arith.constant 0 : i32
    %5 = arith.cmpi ne, %4, %c0_i32_2 : i32
    scf.if %5 {
      %c0_i32_3 = arith.constant 0 : i32
      %c0_i32_4 = arith.constant 0 : i32
      %6 = tpu.memref_slice %arg1[%c0_i32_3, %c0_i32_4] : memref<1x2048xf32, #tpu.memory_space<any>> -> memref<1x2048xf32, #tpu.memory_space<any>>
      %c0_i32_5 = arith.constant 0 : i32
      %c0_i32_6 = arith.constant 0 : i32
      %7 = tpu.memref_slice %arg2[%c0_i32_5, %c0_i32_6] : memref<1x2048xf32, #tpu.memory_space<any>> -> memref<1x2048xf32, #tpu.memory_space<any>>
      tpu.enqueue_dma source(%6 : memref<1x2048xf32, #tpu.memory_space<any>>) target(%7 : memref<1x2048xf32, #tpu.memory_space<any>>) target_semaphore(%arg3 : memref<!tpu.dma_semaphore, #tpu.memory_space<semaphore_mem>>)
      %c0_i32_7 = arith.constant 0 : i32
      %c0_i32_8 = arith.constant 0 : i32
      %8 = tpu.memref_slice %arg1[%c0_i32_7, %c0_i32_8] : memref<1x2048xf32, #tpu.memory_space<any>> -> memref<1x2048xf32, #tpu.memory_space<any>>
      %c0_i32_9 = arith.constant 0 : i32
      %c0_i32_10 = arith.constant 0 : i32
      %9 = tpu.memref_slice %arg2[%c0_i32_9, %c0_i32_10] : memref<1x2048xf32, #tpu.memory_space<any>> -> memref<1x2048xf32, #tpu.memory_space<any>>
      tpu.wait_dma2 semaphore(%arg3 : memref<!tpu.dma_semaphore, #tpu.memory_space<semaphore_mem>>) src(%8 : memref<1x2048xf32, #tpu.memory_space<any>>) dst(%9 : memref<1x2048xf32, #tpu.memory_space<any>>)
    } else {
    }
    return
  }
}

</mosaic_0001>

<bundles_post_ra>
// kernel: tpu_custom_call.1
= control target key start
LH: loop header
LB: loop body
LE: loop exit
PB: predicated region body
PF: predicated region fallthrough
CT: control target
= control target key end

     0   :  { %s63_s6 = smov [#allocation2]   ;;  %s64_s7 = smov [#allocation5]   ;;  %s82_s0 = inlined_call_operand.hbm [shape: f32[1,2048], index: 0, kind: input, shape index: {}]   ;;  %s83_s1 = inlined_call_operand.hbm [shape: f32[1,2048], index: 1, kind: output, shape index: {}]  }
   0x1   :  { %s65_s8 = smov 0  }
   0x2   :  { %47 = dma.general %s82_s0, 256, %s83_s1, %s63_s6, %s64_s7, [#allocation6], %s65_s8, 0  }
   0x3   :  { %61 = dma.done.wait [#allocation2], 256 }
   0x4   :  { %62 = vsyncadd [#allocation2], 4294967040 }
   0x5   :  { %51 = vsyncmov [#allocation2] }
   0x8   :  { %s52_s13 = vpop.sfrf %51 }
   0x9   :  { %p57_p0 = scmp.ne.s32.totalorder %s52_s13, 0 }
   0xb   :  { %56 = shalt.err (%p57_p0)  }

</bundles_post_ra>
